<compile_context>
chip_gen: v7x
topology: tpu7x:2x2x1
jax: 0.10.0
libtpu: 0.0.40
codegen_flags: <defaults>
</compile_context>

<pallas_src>
import functools
import math

import jax
import jax.numpy as jnp
from jax import lax
from jax.experimental import pallas as pl
from jax.experimental.pallas import tpu as pltpu


def _attention_head_kernel(x_ref, wqkv_ref, bqkv_ref, o_ref, *, seq_len,
                           head_size):
    # x_ref:    (Bb*T, C)  f32   (batch block flattened into rows)
    # wqkv_ref: (C, P)     bf16  columns = [q | k | v | 0-pad], P multiple of
    #                            128; 1/sqrt(C) folded into the q columns
    # bqkv_ref: (1, P)     f32
    # o_ref:    (Bb*T, P)  f32   columns [2H:3H] hold the attention output
    T = seq_len
    H = head_size
    BT = x_ref.shape[0]

    # In-kernel bf16 cast: cheap VPU work hidden under the matmul; avoids a
    # separate XLA cast pass over x in HBM.
    x = x_ref[...].astype(jnp.bfloat16)

    # Fused, padded Q/K/V projection: one (BT, C) @ (C, P) MXU pass with f32
    # accumulation; N = P = 128 is a full lane tile.
    qkv = jnp.dot(x, wqkv_ref[...], preferred_element_type=jnp.float32)
    qkv = qkv + bqkv_ref[...]                      # (BT, P) f32
    qkv_b = qkv.astype(jnp.bfloat16)               # single convert pass

    q = qkv_b[:, 0 * H:1 * H]                      # scale already folded in
    k = qkv_b[:, 1 * H:2 * H]

    # Scores: one flat (BT, H) x (H, BT) MXU pass (trans-B dot_general, no
    # explicit k transpose).  Cross-batch entries are removed by the mask
    # below, so flattening the batch into the matmul rows is exact.
    s = lax.dot_general(q, k, (((1,), (1,)), ((), ())),
                        preferred_element_type=jnp.float32)    # (BT, BT)

    # Combined block-diagonal (same batch element) AND causal mask from a
    # single pair of 2-D iotas.
    row = lax.broadcasted_iota(jnp.int32, (BT, BT), 0)
    col = lax.broadcasted_iota(jnp.int32, (BT, BT), 1)
    if (T & (T - 1)) == 0:                         # power-of-two T -> shifts
        shift = T.bit_length() - 1
        same_batch = (row >> shift) == (col >> shift)
    else:
        same_batch = (row // T) == (col // T)
    mask = same_batch & (col <= row)
    s = jnp.where(mask, s, -jnp.inf)

    # Numerically stable softmax in f32 (v5e has no bf16 VPU/EUP path); the
    # reciprocal runs on the EUP (approx -> vrcp).
    s = s - jnp.max(s, axis=-1, keepdims=True)
    p = jnp.exp(s)
    p = p * pl.reciprocal(jnp.sum(p, axis=-1, keepdims=True), approx=True)

    # TODO(synk): dropout on `p` (training mode) not implemented.

    # PV: one (BT, BT) x (BT, P) MXU pass.  Using the whole padded qkv slab
    # as the RHS keeps the stored output lane-dense (P = 128 lanes, unmasked
    # stores); the p @ v product lands in columns [2H:3H].
    out = jnp.dot(p.astype(jnp.bfloat16), qkv_b,
                  preferred_element_type=jnp.float32)           # (BT, P) f32
    o_ref[...] = out.astype(o_ref.dtype)


def _default_block_b(batch):
    """Whole batch per grid step on single-TC chips; B//2 on v7x (2 TCs)."""
    kind = ""
    try:
        kind = jax.devices()[0].device_kind.lower()
    except Exception:
        pass
    if ("v7" in kind or "7x" in kind) and batch % 2 == 0:
        return batch // 2          # 2 parallel grid steps -> both TensorCores
    return batch                   # v5e/v6e: one step, no per-step overhead


def attention_head(x, wk, bk, wq, bq, wv, bv, *, block_b=None):
    """x: (B, T, C) float32; weights (C, H); biases (1, H). Returns (B, T, H)."""
    B, T, C = x.shape
    H = wk.shape[1]

    # ---- weight-side constant folds (tiny (C,H)/(1,H) params) --------------
    scale = C ** (-0.5)
    # Fuse the three projections into one weight/bias with columns
    # [q*scale | k | v], then zero-pad the column dim to a multiple of 128 so
    # the qkv intermediate and the stored output slab are lane-dense.
    w_qkv = jnp.concatenate([wq * scale, wk, wv], axis=1)
    b_qkv = jnp.concatenate([bq * scale, bk, bv], axis=1)
    pad = (-w_qkv.shape[1]) % 128
    if pad:
        w_qkv = jnp.concatenate([w_qkv, jnp.zeros((C, pad), w_qkv.dtype)], axis=1)
        b_qkv = jnp.concatenate([b_qkv, jnp.zeros((1, pad), b_qkv.dtype)], axis=1)
    P = w_qkv.shape[1]
    w_qkv = w_qkv.astype(jnp.bfloat16)
    b_qkv = b_qkv.astype(jnp.float32)

    # Metadata-only flatten of (B, T) into matmul rows; x stays f32 (the bf16
    # cast happens inside the kernel, not as a separate XLA pass).
    x2 = x.reshape(B * T, C)

    if block_b is None:
        block_b = _default_block_b(B)
    assert B % block_b == 0, "block_b must divide B"
    nb = B // block_b

    kernel = functools.partial(_attention_head_kernel, seq_len=T, head_size=H)

    out_wide = pl.pallas_call(
        kernel,
        out_shape=jax.ShapeDtypeStruct((B * T, P), jnp.float32),
        grid_spec=pltpu.PrefetchScalarGridSpec(
            num_scalar_prefetch=0,
            grid=(nb,),
            in_specs=[
                pl.BlockSpec((block_b * T, C), lambda b: (b, 0)),   # x (f32)
                pl.BlockSpec((C, P), lambda b: (0, 0)),             # fused W
                pl.BlockSpec((1, P), lambda b: (0, 0)),             # fused bias
            ],
            out_specs=pl.BlockSpec((block_b * T, P), lambda b: (b, 0)),
        ),
        compiler_params=pltpu.CompilerParams(
            dimension_semantics=("parallel",)),
    )(x2, w_qkv, b_qkv)

    # Layout plumbing only: take the v-product columns and restore (B, T, H).
    return out_wide[:, 2 * H:3 * H].reshape(B, T, H)


def reference(x, wk, bk, wq, bq, wv, bv):
    """Pure-JAX f32 reference mirroring the PyTorch forward (eval mode)."""
    B, T, C = x.shape
    k = x @ wk + bk
    q = x @ wq + bq
    v = x @ wv + bv
    w = (q @ jnp.swapaxes(k, -2, -1)) * C ** (-0.5)
    tril = jnp.tril(jnp.ones((T, T)))
    w = jnp.where(tril == 0, -jnp.inf, w)
    w = jax.nn.softmax(w, axis=-1)
    return w @ v


if __name__ == "__main__":
    # Module hyper-params (small, consistent with the PyTorch forward):
    n_embed = 32     # C
    head_size = 16   # H
    block_size = 8   # T (mask size; here T == block_size)
    B, T = 2, block_size

    key = jax.random.PRNGKey(0)
    kx, k1, k2, k3, k4, k5, k6 = jax.random.split(key, 7)

    x = jax.random.normal(kx, (B, T, n_embed), dtype=jnp.float32)

    # nn.Linear init: U(-1/sqrt(in_features), 1/sqrt(in_features)) for W and b.
    bound = 1.0 / math.sqrt(n_embed)
    init = lambda k, shape: jax.random.uniform(
        k, shape, dtype=jnp.float32, minval=-bound, maxval=bound)

    wk = init(k1, (n_embed, head_size)); bk = init(k2, (1, head_size))
    wq = init(k3, (n_embed, head_size)); bq = init(k4, (1, head_size))
    wv = init(k5, (n_embed, head_size)); bv = init(k6, (1, head_size))

    out = attention_head(x, wk, bk, wq, bq, wv, bv)
    out = jax.block_until_ready(out)

    ref = reference(x, wk, bk, wq, bq, wv, bv)
    assert out.shape == (B, T, head_size)
    # Tolerance loosened vs 1e-5 because the kernel uses bf16 MXU operands
    # (f32 accumulation) and an approximate EUP reciprocal in the softmax.
    assert jnp.allclose(out, ref, atol=2e-2, rtol=2e-2), "mismatch vs reference"

    print("KERNEL_OK")
</pallas_src>

<mosaic_0001>
module attributes {stable_mosaic.version = 11 : i64} {
  func.func @_attention_head_kernel(%arg0: i32, %arg1: memref<16x32xf32, #tpu.memory_space<vmem>>, %arg2: memref<32x128xbf16, #tpu.memory_space<vmem>>, %arg3: memref<1x128xf32, #tpu.memory_space<vmem>>, %arg4: memref<16x128xf32, #tpu.memory_space<vmem>>) attributes {dimension_semantics = [#tpu.dimension_semantics<parallel>], iteration_bounds = array<i64: 1>, scalar_prefetch = 0 : i64, scratch_operands = 0 : i64, tpu.core_type = #tpu.core_type<tc>, window_params = [{transform_indices = @transform_0, window_bounds = array<i64: 16, 32>}, {pipeline_mode = #tpu.pipeline_mode<synchronous>, transform_indices = @transform_1, window_bounds = array<i64: 32, 128>}, {pipeline_mode = #tpu.pipeline_mode<synchronous>, transform_indices = @transform_2, window_bounds = array<i64: 1, 128>}, {transform_indices = @transform_3, window_bounds = array<i64: 16, 128>}]} {
    %c0 = arith.constant 0 : index
    %c0_0 = arith.constant 0 : index
    %0 = vector.load %arg1[%c0, %c0_0] : memref<16x32xf32, #tpu.memory_space<vmem>>, vector<16x32xf32>
    %1 = arith.truncf %0 : vector<16x32xf32> to vector<16x32xbf16>
    %c0_1 = arith.constant 0 : index
    %c0_2 = arith.constant 0 : index
    %2 = vector.load %arg2[%c0_1, %c0_2] : memref<32x128xbf16, #tpu.memory_space<vmem>>, vector<32x128xbf16>
    %cst = arith.constant dense<0.000000e+00> : vector<16x128xf32>
    %3 = tpu.matmul %1, %2, %cst {dimension_numbers = #tpu.dot_dimension_numbers<[1], [0], [0], [1], [0, 0, 1, 1], [], []>} : vector<16x32xbf16>, vector<32x128xbf16>, vector<16x128xf32> -> vector<16x128xf32>
    %c0_3 = arith.constant 0 : index
    %c0_4 = arith.constant 0 : index
    %4 = vector.load %arg3[%c0_3, %c0_4] : memref<1x128xf32, #tpu.memory_space<vmem>>, vector<1x128xf32>
    %5 = vector.broadcast %4 : vector<1x128xf32> to vector<16x128xf32>
    %6 = arith.addf %3, %5 : vector<16x128xf32>
    %7 = arith.truncf %6 : vector<16x128xf32> to vector<16x128xbf16>
    %8 = vector.extract_strided_slice %7 {offsets = [0, 0], sizes = [16, 16], strides = [1, 1]} : vector<16x128xbf16> to vector<16x16xbf16>
    %9 = vector.extract_strided_slice %7 {offsets = [0, 16], sizes = [16, 16], strides = [1, 1]} : vector<16x128xbf16> to vector<16x16xbf16>
    %cst_5 = arith.constant dense<0.000000e+00> : vector<16x16xf32>
    %10 = tpu.matmul %8, %9, %cst_5 {dimension_numbers = #tpu.dot_dimension_numbers<[1], [1], [0], [0], [0, 0, 1, 0], [], []>} : vector<16x16xbf16>, vector<16x16xbf16>, vector<16x16xf32> -> vector<16x16xf32>
    %11 = tpu.iota {dimensions = array<i32: 0>} : vector<16x16xi32>
    %12 = tpu.iota {dimensions = array<i32: 1>} : vector<16x16xi32>
    %c3_i32 = arith.constant 3 : i32
    %13 = vector.broadcast %c3_i32 : i32 to vector<16x16xi32>
    %14 = arith.shrsi %11, %13 : vector<16x16xi32>
    %c3_i32_6 = arith.constant 3 : i32
    %15 = vector.broadcast %c3_i32_6 : i32 to vector<16x16xi32>
    %16 = arith.shrsi %12, %15 : vector<16x16xi32>
    %17 = arith.cmpi eq, %14, %16 : vector<16x16xi32>
    %18 = arith.cmpi sle, %12, %11 : vector<16x16xi32>
    %19 = arith.andi %17, %18 : vector<16x16xi1>
    %cst_7 = arith.constant 0xFF800000 : f32
    %20 = vector.broadcast %cst_7 : f32 to vector<16x16xf32>
    %21 = arith.select %19, %10, %20 : vector<16x16xi1>, vector<16x16xf32>
    %cst_8 = arith.constant dense<0xFF800000> : vector<16xf32>
    %22 = vector.multi_reduction <maximumf>, %21, %cst_8 [1] : vector<16x16xf32> to vector<16xf32>
    %23 = vector.shape_cast %22 : vector<16xf32> to vector<16x1xf32>
    %24 = vector.broadcast %23 : vector<16x1xf32> to vector<16x16xf32>
    %25 = arith.subf %21, %24 : vector<16x16xf32>
    %26 = math.exp %25 : vector<16x16xf32>
    %cst_9 = arith.constant dense<0.000000e+00> : vector<16xf32>
    %27 = vector.multi_reduction <add>, %26, %cst_9 [1] : vector<16x16xf32> to vector<16xf32>
    %28 = vector.shape_cast %27 : vector<16xf32> to vector<16x1xf32>
    %29 = tpu.reciprocal %28 {approx = true} : vector<16x1xf32> -> vector<16x1xf32>
    %30 = vector.broadcast %29 : vector<16x1xf32> to vector<16x16xf32>
    %31 = arith.mulf %26, %30 : vector<16x16xf32>
    %32 = arith.truncf %31 : vector<16x16xf32> to vector<16x16xbf16>
    %cst_10 = arith.constant dense<0.000000e+00> : vector<16x128xf32>
    %33 = tpu.matmul %32, %7, %cst_10 {dimension_numbers = #tpu.dot_dimension_numbers<[1], [0], [0], [1], [0, 0, 1, 1], [], []>} : vector<16x16xbf16>, vector<16x128xbf16>, vector<16x128xf32> -> vector<16x128xf32>
    %c0_11 = arith.constant 0 : index
    %c0_12 = arith.constant 0 : index
    %34 = vector.load %arg4[%c0_11, %c0_12] : memref<16x128xf32, #tpu.memory_space<vmem>>, vector<16x128xf32>
    tpu.vector_store %arg4[%c0_11, %c0_12], %33 {strides = array<i32>} : memref<16x128xf32, #tpu.memory_space<vmem>>, vector<16x128xf32>,
    return
  }
  func.func @transform_0(%arg0: i32) -> (i32, i32) {
    %c0_i32 = arith.constant 0 : i32
    %c0_i32_0 = arith.constant 0 : i32
    return %arg0, %c0_i32 : i32, i32
  }
  func.func @transform_1(%arg0: i32) -> (i32, i32) {
    %c0_i32 = arith.constant 0 : i32
    %c0_i32_0 = arith.constant 0 : i32
    %c0_i32_1 = arith.constant 0 : i32
    return %c0_i32, %c0_i32_0 : i32, i32
  }
  func.func @transform_2(%arg0: i32) -> (i32, i32) {
    %c0_i32 = arith.constant 0 : i32
    %c0_i32_0 = arith.constant 0 : i32
    %c0_i32_1 = arith.constant 0 : i32
    return %c0_i32, %c0_i32_0 : i32, i32
  }
  func.func @transform_3(%arg0: i32) -> (i32, i32) {
    %c0_i32 = arith.constant 0 : i32
    %c0_i32_0 = arith.constant 0 : i32
    return %arg0, %c0_i32 : i32, i32
  }
}

</mosaic_0001>

<bundles_post_ra>
// kernel: tpu_custom_call.1
= control target key start
LH: loop header
LB: loop body
LE: loop exit
PB: predicated region body
PF: predicated region fallthrough
CT: control target
= control target key end

     0   :  { %8 = vsyncpa [#allocation3], 0  ;;  %s477_s0 = inlined_call_operand.hbm [shape: f32[16,32], index: 0, kind: input, shape index: {}]   ;;  %s478_s1 = inlined_call_operand.hbm [shape: bf16[32,128], index: 1, kind: input, shape index: {}]   ;;  %s479_s2 = inlined_call_operand.vmem [shape: f32[1,128], index: 2, kind: input, shape index: {}]   ;;  %s480_s3 = inlined_call_operand.hbm [shape: f32[16,128], index: 3, kind: output, shape index: {}]  }
   0x1   :  { %9 = vsyncpa [#allocation6], 0 }
   0x2   :  { %10 = vsyncpa [#allocation4], 0  ;;  %s395_s12 = smov [#allocation2]   ;;  %s323_s16 = scalar_lea.hbm %s477_s0, 256 }
   0x3   :  { %s16_s13 = sshll.u32 %s395_s12, 4  ;;  %p324_p0 = scmp.ne.s32.totalorder %s477_s0, %s323_s16  ;;  %s17_s13 = int_to_ptr.vmem [resolvable:$true] %s16_s13 }
   0x4   :  { %p327_p1 = scmp.lt.u32.totalorder %s323_s16, %s477_s0 }
   0x6   :  { %p329_p2 = pnand %p327_p1, %p324_p0 }
   0x8   :  { %332 = shalt.err (!%p329_p2)
}
   0x9   :  { %s333_s21 = scalar_lea.vmem %s17_s13, 256  ;;  %p338_p4 = scmp.lt.s32.totalorder %s17_s13, %s17_s13 }
   0xa   :  { %p334_p3 = scmp.ne.s32.totalorder %s17_s13, %s333_s21  ;;  %p339_p5 = scmp.lt.s32.totalorder %s333_s21, %s333_s21 }
   0xc   :  { %p340_p6 = por %p339_p5, %p338_p4 }
   0xe   :  { %p341_p7 = pnand %p340_p6, %p334_p3 }
  0x10   :  { %344 = shalt.err (!%p341_p7)
}
  0x11   :  { %s396_s22 = smov 128   ;;  %s397_s23 = smov 8  }
  0x12   :  { %22 = dma.hbm_to_vmem [thread:$0]  %s477_s0, 256, %s17_s13, [#allocation3], %s396_s22, %s396_s22, %s397_s23  }
  0x13   :  { %s398_s26 = smov [#allocation5]   ;;  %s345_s30 = scalar_lea.hbm %s478_s1, 256 }
  0x14   :  { %s28_s27 = sshll.u32 %s398_s26, 4  ;;  %p346_p8 = scmp.ne.s32.totalorder %s478_s1, %s345_s30  ;;  %s29_s27 = int_to_ptr.vmem [resolvable:$true] %s28_s27 }
  0x15   :  { %p349_p9 = scmp.lt.u32.totalorder %s345_s30, %s478_s1 }
  0x17   :  { %p351_p10 = pnand %p349_p9, %p346_p8 }
  0x19   :  { %354 = shalt.err (!%p351_p10)
}
  0x1a   :  { %s355_s8 = scalar_lea.vmem %s29_s27, 256  ;;  %p360_p12 = scmp.lt.s32.totalorder %s29_s27, %s29_s27 }
  0x1b   :  { %p356_p11 = scmp.ne.s32.totalorder %s29_s27, %s355_s8  ;;  %p361_p13 = scmp.lt.s32.totalorder %s355_s8, %s355_s8 }
  0x1d   :  { %p362_p0 = por %p361_p13, %p360_p12 }
  0x1f   :  { %p363_p1 = pnand %p362_p0, %p356_p11 }
  0x21   :  { %366 = shalt.err (!%p363_p1)
}
  0x22   :  { %s399_s0 = smov 64   ;;  %s400_s9 = smov 4  }
  0x23   :  { %34 = dma.hbm_to_vmem [thread:$0]  %s478_s1, 256, %s29_s27, [#allocation6], %s399_s0, %s399_s0, %s400_s9  }
  0x24   :  { %389 = dma.done.wait [#allocation3], 256  }
  0x25   :  { %390 = vsyncadd [#allocation3], 4294967040 }
  0x26   :  { %391 = dma.done.wait [#allocation6], 256  }
  0x27   :  { %392 = vsyncadd [#allocation6], 4294967040  ;;  %v401_v0 = vmov 0.0   ;;  %vm402_vm0 = vmmov 0   ;;  %v313_v1 = vld [vmem:[#allocation5] sm:$0xff]   ;;  %v314_v2 = vld [vmem:[#allocation5 + $0x8] sm:$0xff]   ;;  %v167_v16 = vlaneseq }
  0x28   :  { %283 = vmatprep.subr.bf16.mxu0 %v401_v0  ;;  %287 = vmatprep.mubr.msk.bf16.mxu0 %vm402_vm0, %v401_v0  ;;  %v44_v3 = vld [vmem:[#allocation2] sm:$0xff]  ;;  %v45_v4 = vld [vmem:[#allocation2 + $0x8] sm:$0xff]  ;;  %vm70_vm1 = vcmask 261120   ;;  %s403_s13 = smov 112   ;;  %vm119_vm2 = vcmask 130048  }
  0x29   :  { %291 = vmatprep.subr.bf16.mxu1 %v401_v0  ;;  %293 = vmatprep.mubr.msk.bf16.mxu1 %vm402_vm0, %v401_v0  ;;  %v46_v5 = vpack.c.bf16 %v45_v4, %v44_v3  ;;  %v270_v6 = vld [vmem:[%s479_s2] ss:$0 sm:$0xff]  ;;  %v168_v17 = vshrl.u32 %v167_v16, 7  ;;  %v171_v18 = vand.u32 127, %v167_v16  ;;  %s404_s2 = smov [#allocation7]  }
  0x2a   :  { %284 = vmatpush3.bf16.msra.mxu0 %v313_v1  ;;  %s257_s14 = sshll.u32 %s404_s2, 4  ;;  %s258_s14 = int_to_ptr.vmem [resolvable:$true] %s257_s14 }
  0x2b   :  { %285 = vmatprep.subr.bf16.mxu0 %v401_v0  ;;  %v169_v19 = vadd.s32 8, %v168_v17  ;;  %v172_v20 = vshra.s32 %v168_v17, 3  ;;  %v174_v21 = vshra.s32 %v171_v18, 3  ;;  %vm177_vm4 = vcmp.le.s32.totalorder %v171_v18, %v168_v17  ;;  %s367_s15 = scalar_lea.vmem %s258_s14, 256  ;;  %p372_p3 = scmp.lt.s32.totalorder %s258_s14, %s258_s14 }
  0x2c   :  { %p368_p2 = scmp.ne.s32.totalorder %s258_s14, %s367_s15  ;;  %p373_p4 = scmp.lt.s32.totalorder %s367_s15, %s367_s15 }
  0x2d   :  { %v173_v22 = vshra.s32 %v169_v19, 3  ;;  %vm175_vm3 = vcmp.eq.s32.totalorder %v172_v20, %v174_v21  ;;  %vm178_vm6 = vcmp.le.s32.totalorder %v171_v18, %v169_v19 }
  0x2e   :  { %286 = vmatpush3.bf16.msra.mxu0 %v314_v2  ;;  %vm179_vm7 = vmand %vm175_vm3, %vm177_vm4  ;;  %p374_p5 = por %p373_p4, %p372_p3 }
  0x2f   :  { %297 = vmatprep.subr.bf16.mxu0 %v401_v0  ;;  %vm176_vm5 = vcmp.eq.s32.totalorder %v173_v22, %v174_v21 }
  0x30   :  { %vm180_vm8 = vmand %vm176_vm5, %vm178_vm6  ;;  %p375_p6 = pnand %p374_p5, %p368_p2 }
  0x31   :  { %288 = vmatmul.mubr.msk.bf16.vlgmr.msra.gmra.mrb[0].mxu0 %vm70_vm1, %v46_v5 }
  0x32   :  { %299 = vmatprep.mubr.msk.bf16.mxu0 %vm402_vm0, %v401_v0 }
 0x104   :  { %v108_v7 = vpop.f32.mrb[0].mxu0 }
 0x105   :  { %v289_v8 = vpop.f32.mrb[1].mxu0  ;;  %v109_v10 = vadd.f32 %v270_v6, %v108_v7 }
 0x106   :  { %v111_v9 = vpop.f32.mrb[2].mxu0 }
 0x107   :  { %v112_v11 = vadd.f32 %v270_v6, %v111_v9  ;;  %v290_v12 = vpop.f32.mrb[3].mxu0 }
 0x109   :  { %v115_v13 = vpack.c.bf16 %v112_v11, %v109_v10 }
 0x10b   :  { %117 = vrot.lane.b32.xlu0 %v115_v13, %s403_s13  ;;  %298 = vmatpush3.bf16.msra.mxu0 %v115_v13 }
 0x17d   :  { %v118_v14 = vpop.permute.xlu0 %117 }
 0x17e   :  { %v124_v15 = vsel %vm119_vm2, %v118_v14, 0 }
 0x17f   :  { %292 = vmatpush3.bf16.xpose.msra.mxu1 %v124_v15 }
 0x186   :  { %294 = vmatmul.mubr.msk.bf16.vlgmr.msra.gmra.mrb[0].mxu1 %vm119_vm2, %v115_v13 }
 0x259   :  { %v160_v23 = vpop.f32.mrb[0].mxu1 }
 0x25a   :  { %v181_v24 = vsel %vm179_vm7, %v160_v23, -inf  ;;  %v295_v25 = vpop.f32.mrb[1].mxu1 }
 0x25b   :  { %v163_v26 = vpop.f32.mrb[2].mxu1  ;;  %v183_v27 = vsel %vm119_vm2, %v181_v24, -inf }
 0x25c   :  { %v182_v28 = vsel %vm180_vm8, %v163_v26, -inf  ;;  %184 = vmax.xlane.f32.xlu0 %v183_v27  ;;  %v296_v29 = vpop.f32.mrb[3].mxu1 }
 0x25d   :  { %v186_v30 = vsel %vm119_vm2, %v182_v28, -inf }
 0x25e   :  { %187 = vmax.xlane.f32.xlu1 %v186_v30 }
 0x2e9   :  { %v185_v31 = vpop.xlane.xlu0 %184 }
 0x2ea   :  { %v189_v32 = vsub.f32 %v181_v24, %v185_v31 }
 0x2eb   :  { %v188_v33 = vpop.xlane.xlu1 %187 }
 0x2ec   :  { %v191_v34 = vmul.f32 1.442695, %v189_v32  ;;  %v190_v35 = vsub.f32 %v182_v28, %v188_v33 }
 0x2ee   :  { %315 = vpow2.f32 %v191_v34  ;;  %v193_v36 = vmul.f32 1.442695, %v190_v35 }
 0x2f0   :  { %317 = vpow2.f32 %v193_v36 }
 0x2f8   :  { %v316_v37 = vpop.eup %315 }
 0x2f9   :  { %v195_v38 = vsel %vm119_vm2, %v316_v37, 0.0 }
 0x2fa   :  { %v318_v39 = vpop.eup %317  ;;  %196 = vadd.xlane.f32.xlu1 %v195_v38 }
 0x2fb   :  { %v198_v40 = vsel %vm119_vm2, %v318_v39, 0.0 }
 0x2fe   :  { %199 = vadd.xlane.f32.xlu1 %v198_v40 }
 0x387   :  { %v197_v41 = vpop.xlane.xlu1 %196 }
 0x388   :  { %319 = vrcp.f32 %v197_v41 }
 0x38b   :  { %v200_v42 = vpop.xlane.xlu1 %199 }
 0x38c   :  { %321 = vrcp.f32 %v200_v42 }
 0x392   :  { %v320_v43 = vpop.eup %319 }
 0x393   :  { %v203_v45 = vmul.f32 %v320_v43, %v316_v37 }
 0x396   :  { %v322_v44 = vpop.eup %321 }
 0x397   :  { %v204_v46 = vmul.f32 %v322_v44, %v318_v39 }
 0x399   :  { %v205_v47 = vpack.c.bf16 %v204_v46, %v203_v45 }
 0x39b   :  { %300 = vmatmul.mubr.msk.bf16.vlgmr.msra.gmra.mrb[4].mxu0 %vm119_vm2, %v205_v47 }
 0x46e   :  { %v243_v48 = vpop.f32.mrb[4].mxu0 }
 0x46f   :  { %250 = vst [vmem:[#allocation7] sm:$0xff] %v243_v48  ;;  %v301_v49 = vpop.f32.mrb[5].mxu0 }
 0x470   :  { %v246_v50 = vpop.f32.mrb[6].mxu0 }
 0x471   :  { %251 = vst [vmem:[#allocation7 + $0x8] sm:$0xff] %v246_v50  ;;  %v302_v51 = vpop.f32.mrb[7].mxu0 }
 0x472   :  { %378 = shalt.err (!%p375_p6)
}
 0x473   :  { %s379_s18 = scalar_lea.hbm %s480_s3, 256 }
 0x474   :  { %p380_p7 = scmp.ne.s32.totalorder %s480_s3, %s379_s18  ;;  %p383_p8 = scmp.lt.u32.totalorder %s379_s18, %s480_s3 }
 0x476   :  { %p385_p9 = pnand %p383_p8, %p380_p7 }
 0x478   :  { %388 = shalt.err (!%p385_p9)
}
 0x479   :  { %263 = dma.vmem_to_hbm [thread:$0]  %s258_s14, 256, %s480_s3, [#allocation4], %s396_s22, %s396_s22, %s397_s23  }
 0x47a   :  { %393 = dma.done.wait [#allocation4], 256  }
 0x47b   :  { %394 = vsyncadd [#allocation4], 4294967040 }
 0x47c   :  { %267 = vsyncpa [#allocation3], 1 }
 0x47d   :  { %268 = vsyncpa [#allocation6], 1 }
 0x47e   :  { %269 = vsyncpa [#allocation4], 1 }

</bundles_post_ra>
